<compile_context>
chip_gen: v6e
topology: v6e:2x2x1
jax: 0.10.0
libtpu: 0.0.40
codegen_flags: <defaults>
</compile_context>

<pallas_src>
import functools

import jax
import jax.numpy as jnp
from jax.experimental import pallas as pl
from jax.experimental.pallas import tpu as pltpu


def _triplet_loss_kernel(a_ref, p_ref, n_ref, o_ref, *, margin):
    # Load native-dtype tiles from VMEM and cast to f32 for the arithmetic
    # (v5e VPU has no bf16 ALU; the cast is free relative to DMA savings).
    a = a_ref[...].astype(jnp.float32)            # (TB, D)
    p = p_ref[...].astype(jnp.float32)
    n = n_ref[...].astype(jnp.float32)

    dp = a - p
    dn = a - n
    # Fused: single cross-lane reduction instead of two.
    d = dp * dp - dn * dn                         # (TB, D)
    row = jnp.sum(d, axis=1, keepdims=True)       # (TB, 1) == dp_sum - dn_sum

    o_ref[...] = jnp.maximum(row + jnp.float32(margin), 0.0)


def _pick_block_b(B, D, itemsize):
    """Batch-tile size: 3 inputs x 2 buffers x TB x D x itemsize <= ~8 MiB."""
    budget = 8 * 1024 * 1024
    tb = budget // (6 * D * itemsize)
    tb = max(8, min(int(tb), 1024))
    tb = (tb // 8) * 8                            # sublane-aligned
    if tb >= B:
        return B                                  # single full block (always legal)
    return tb


def triplet_loss(anchor, positive, negative, margin, size_average=True,
                 block_b=None):
    """Pallas TPU implementation of TripletLoss.forward.

    anchor, positive, negative: (B, D) arrays (any float dtype; kept native
    in HBM, accumulated in f32 inside the kernel). Returns a f32 scalar.
    """
    assert anchor.shape == positive.shape == negative.shape
    assert anchor.ndim == 2
    B, D = anchor.shape
    itemsize = jnp.dtype(anchor.dtype).itemsize

    if block_b is None:
        block_b = _pick_block_b(B, D, itemsize)
    grid = (pl.cdiv(B, block_b),)

    in_spec = pl.BlockSpec((block_b, D), lambda i: (i, 0))
    out_spec = pl.BlockSpec((block_b, 1), lambda i: (i, 0))

    kernel = functools.partial(_triplet_loss_kernel, margin=float(margin))

    losses = pl.pallas_call(
        kernel,
        out_shape=jax.ShapeDtypeStruct((B, 1), jnp.float32),
        grid=grid,
        in_specs=[in_spec, in_spec, in_spec],
        out_specs=out_spec,
        compiler_params=pltpu.CompilerParams(
            dimension_semantics=("parallel",),
            vmem_limit_bytes=32 * 1024 * 1024,
        ),
        cost_estimate=pl.CostEstimate(
            flops=5 * B * D,
            transcendentals=0,
            bytes_accessed=3 * B * D * itemsize + B * 4,
        ),
    )(anchor, positive, negative)

    losses = losses[:, 0]                         # (B,) per-row losses
    # Tiny finalization in plain JAX (single tile's worth of data).
    return jnp.mean(losses) if size_average else jnp.sum(losses)


def _reference(anchor, positive, negative, margin, size_average=True):
    a = anchor.astype(jnp.float32)
    p = positive.astype(jnp.float32)
    n = negative.astype(jnp.float32)
    dp = jnp.sum((a - p) ** 2, axis=1)
    dn = jnp.sum((a - n) ** 2, axis=1)
    losses = jnp.maximum(dp - dn + margin, 0.0)
    return jnp.mean(losses) if size_average else jnp.sum(losses)


if __name__ == "__main__":
    key = jax.random.PRNGKey(0)
    k_a, k_p, k_n = jax.random.split(key, 3)

    # Lane/sublane-friendly small embedding batch.
    B, D = 256, 128
    margin = 1.0

    anchor = jax.random.normal(k_a, (B, D), dtype=jnp.float32)
    positive = jax.random.normal(k_p, (B, D), dtype=jnp.float32)
    negative = jax.random.normal(k_n, (B, D), dtype=jnp.float32)

    # 1) default tiling, mean reduction
    loss = triplet_loss(anchor, positive, negative, margin, size_average=True)
    loss = jax.block_until_ready(loss)
    ref = _reference(anchor, positive, negative, margin, size_average=True)
    assert jnp.allclose(loss, ref, rtol=1e-5, atol=1e-5), (loss, ref)

    # 2) sum reduction
    loss_s = triplet_loss(anchor, positive, negative, margin, size_average=False)
    ref_s = _reference(anchor, positive, negative, margin, size_average=False)
    assert jnp.allclose(jax.block_until_ready(loss_s), ref_s,
                        rtol=1e-5, atol=1e-5), (loss_s, ref_s)

    # 3) multi-tile grid with a batch that is NOT a multiple of the tile
    #    (exercises the masked partial edge block).
    B2 = 200
    a2, p2, n2 = anchor[:B2], positive[:B2], negative[:B2]
    loss_m = triplet_loss(a2, p2, n2, margin, size_average=True, block_b=64)
    ref_m = _reference(a2, p2, n2, margin, size_average=True)
    assert jnp.allclose(jax.block_until_ready(loss_m), ref_m,
                        rtol=1e-5, atol=1e-5), (loss_m, ref_m)

    # 4) native bf16 inputs (no wrapper upcast; cast happens inside the kernel)
    loss_bf = triplet_loss(anchor.astype(jnp.bfloat16),
                           positive.astype(jnp.bfloat16),
                           negative.astype(jnp.bfloat16),
                           margin, size_average=True)
    ref_bf = _reference(anchor.astype(jnp.bfloat16),
                        positive.astype(jnp.bfloat16),
                        negative.astype(jnp.bfloat16),
                        margin, size_average=True)
    assert jnp.allclose(jax.block_until_ready(loss_bf), ref_bf,
                        rtol=2e-2, atol=2e-2), (loss_bf, ref_bf)

    print("KERNEL_OK")
</pallas_src>

<mosaic_0001>
module attributes {stable_mosaic.version = 11 : i64} {
  func.func @_triplet_loss_kernel(%arg0: i32, %arg1: memref<256x128xf32, #tpu.memory_space<vmem>>, %arg2: memref<256x128xf32, #tpu.memory_space<vmem>>, %arg3: memref<256x128xf32, #tpu.memory_space<vmem>>, %arg4: memref<256x1xf32, #tpu.memory_space<vmem>>) attributes {dimension_semantics = [#tpu.dimension_semantics<parallel>], iteration_bounds = array<i64: 1>, scalar_prefetch = 0 : i64, scratch_operands = 0 : i64, tpu.core_type = #tpu.core_type<tc>, window_params = [{transform_indices = @transform_0, window_bounds = array<i64: 256, 128>}, {transform_indices = @transform_1, window_bounds = array<i64: 256, 128>}, {transform_indices = @transform_2, window_bounds = array<i64: 256, 128>}, {transform_indices = @transform_3, window_bounds = array<i64: 256, 1>}]} {
    %c0 = arith.constant 0 : index
    %c0_0 = arith.constant 0 : index
    %0 = vector.load %arg1[%c0, %c0_0] : memref<256x128xf32, #tpu.memory_space<vmem>>, vector<256x128xf32>
    %c0_1 = arith.constant 0 : index
    %c0_2 = arith.constant 0 : index
    %1 = vector.load %arg2[%c0_1, %c0_2] : memref<256x128xf32, #tpu.memory_space<vmem>>, vector<256x128xf32>
    %c0_3 = arith.constant 0 : index
    %c0_4 = arith.constant 0 : index
    %2 = vector.load %arg3[%c0_3, %c0_4] : memref<256x128xf32, #tpu.memory_space<vmem>>, vector<256x128xf32>
    %3 = arith.subf %0, %1 : vector<256x128xf32>
    %4 = arith.subf %0, %2 : vector<256x128xf32>
    %5 = arith.mulf %3, %3 : vector<256x128xf32>
    %6 = arith.mulf %4, %4 : vector<256x128xf32>
    %7 = arith.subf %5, %6 : vector<256x128xf32>
    %cst = arith.constant dense<0.000000e+00> : vector<256xf32>
    %8 = vector.multi_reduction <add>, %7, %cst [1] : vector<256x128xf32> to vector<256xf32>
    %9 = vector.shape_cast %8 : vector<256xf32> to vector<256x1xf32>
    %cst_5 = arith.constant 1.000000e+00 : f32
    %10 = vector.broadcast %cst_5 : f32 to vector<256x1xf32>
    %11 = arith.addf %9, %10 : vector<256x1xf32>
    %cst_6 = arith.constant 0.000000e+00 : f32
    %12 = vector.broadcast %cst_6 : f32 to vector<256x1xf32>
    %13 = arith.maximumf %11, %12 : vector<256x1xf32>
    %c0_7 = arith.constant 0 : index
    %c0_8 = arith.constant 0 : index
    %14 = vector.load %arg4[%c0_7, %c0_8] : memref<256x1xf32, #tpu.memory_space<vmem>>, vector<256x1xf32>
    tpu.vector_store %arg4[%c0_7, %c0_8], %13 {strides = array<i32>} : memref<256x1xf32, #tpu.memory_space<vmem>>, vector<256x1xf32>,
    return
  }
  func.func @transform_0(%arg0: i32) -> (i32, i32) {
    %c0_i32 = arith.constant 0 : i32
    %c0_i32_0 = arith.constant 0 : i32
    return %arg0, %c0_i32 : i32, i32
  }
  func.func @transform_1(%arg0: i32) -> (i32, i32) {
    %c0_i32 = arith.constant 0 : i32
    %c0_i32_0 = arith.constant 0 : i32
    return %arg0, %c0_i32 : i32, i32
  }
  func.func @transform_2(%arg0: i32) -> (i32, i32) {
    %c0_i32 = arith.constant 0 : i32
    %c0_i32_0 = arith.constant 0 : i32
    return %arg0, %c0_i32 : i32, i32
  }
  func.func @transform_3(%arg0: i32) -> (i32, i32) {
    %c0_i32 = arith.constant 0 : i32
    %c0_i32_0 = arith.constant 0 : i32
    return %arg0, %c0_i32 : i32, i32
  }
}

</mosaic_0001>

<bundles_post_ra>
// kernel: tpu_custom_call.1
= control target key start
LH: loop header
LB: loop body
LE: loop exit
PB: predicated region body
PF: predicated region fallthrough
CT: control target
= control target key end

     0   :  { %8 = vsyncpa [#allocation3], 0  ;;  %s709_s0 = inlined_call_operand.hbm [shape: f32[256,128], index: 0, kind: input, shape index: {}]   ;;  %s710_s1 = inlined_call_operand.hbm [shape: f32[256,128], index: 1, kind: input, shape index: {}]   ;;  %s711_s2 = inlined_call_operand.hbm [shape: f32[256,128], index: 2, kind: input, shape index: {}]   ;;  %s712_s3 = inlined_call_operand.vmem [shape: f32[256,1], index: 3, kind: output, shape index: {}]  }
   0x1   :  { %9 = vsyncpa [#allocation5], 0  ;;  %s547_s12 = smov [#allocation4]   ;;  %s548_s14 = smov [#allocation2]  }
   0x2   :  { %s27_s13 = sshll.u32 %s547_s12, 4  ;;  %s15_s15 = sshll.u32 %s548_s14, 4  ;;  %s28_s13 = int_to_ptr.vmem [resolvable:$true] %s27_s13  ;;  %s16_s15 = int_to_ptr.vmem [resolvable:$true] %s15_s15 }
   0x3   :  { %s491_s16 = scalar_lea.vmem %s28_s13, 4096  ;;  %p496_p1 = scmp.lt.s32.totalorder %s28_s13, %s28_s13 }
   0x4   :  { %p492_p0 = scmp.ne.s32.totalorder %s28_s13, %s491_s16  ;;  %p497_p2 = scmp.lt.s32.totalorder %s491_s16, %s491_s16 }
   0x6   :  { %p498_p3 = por %p497_p2, %p496_p1 }
   0x8   :  { %p499_p4 = pnand %p498_p3, %p492_p0 }
   0xa   :  { %502 = shalt.err (!%p499_p4)
}
   0xb   :  { %s549_s17 = smov 128   ;;  %s550_s18 = smov 8  }
   0xc   :  { %33 = dma.hbm_to_vmem [thread:$0]  %s710_s1, 4096, %s28_s13, [#allocation5], %s549_s17, %s549_s17, %s550_s18  }
   0xd   :  { %s511_s21 = scalar_lea.vmem %s16_s15, 4096  ;;  %p516_p6 = scmp.lt.s32.totalorder %s16_s15, %s16_s15 }
   0xe   :  { %p512_p5 = scmp.ne.s32.totalorder %s16_s15, %s511_s21  ;;  %p517_p7 = scmp.lt.s32.totalorder %s511_s21, %s511_s21 }
  0x10   :  { %p518_p8 = por %p517_p7, %p516_p6 }
  0x12   :  { %p519_p9 = pnand %p518_p8, %p512_p5 }
  0x14   :  { %522 = shalt.err (!%p519_p9)
}
  0x15   :  { %21 = dma.hbm_to_vmem [thread:$0]  %s709_s0, 4096, %s16_s15, [#allocation3], %s549_s17, %s549_s17, %s550_s18  }
  0x16   :  { %s551_s24 = smov [#allocation6]  }
  0x17   :  { %s39_s25 = sshll.u32 %s551_s24, 4  ;;  %s40_s25 = int_to_ptr.vmem [resolvable:$true] %s39_s25 }
  0x18   :  { %s531_s26 = scalar_lea.vmem %s40_s25, 4096  ;;  %p536_p11 = scmp.lt.s32.totalorder %s40_s25, %s40_s25 }
  0x19   :  { %p532_p10 = scmp.ne.s32.totalorder %s40_s25, %s531_s26  ;;  %p537_p12 = scmp.lt.s32.totalorder %s531_s26, %s531_s26 }
  0x1b   :  { %p538_p13 = por %p537_p12, %p536_p11 }
  0x1d   :  { %p539_p0 = pnand %p538_p13, %p532_p10 }
  0x1f   :  { %542 = shalt.err (!%p539_p0)
}
  0x20   :  { %45 = dma.hbm_to_vmem [thread:$0]  %s711_s2, 4096, %s40_s25, [#allocation5], %s549_s17, %s549_s17, %s550_s18  }
  0x21   :  { %543 = dma.done.wait [#allocation3], 4096  }
  0x22   :  { %544 = vsyncadd [#allocation3], 4294963200 }
  0x23   :  { %545 = dma.done.wait [#allocation5], 8192  }
  0x24   :  { %546 = vsyncadd [#allocation5], 4294959104  ;;  %v57_v0 = vld [vmem:[#allocation2 + $0x10] sm:$0xff]  ;;  %v55_v5 = vld [vmem:[#allocation2] sm:$0xff]  ;;  %vm439_vm0 = vcmask 7168  }
  0x25   :  { %v89_v1 = vld [vmem:[#allocation4 + $0x10] sm:$0xff]  ;;  %v87_v6 = vld [vmem:[#allocation4] sm:$0xff]  ;;  %v58_v10 = vld [vmem:[#allocation2 + $0x18] sm:$0xff] }
  0x26   :  { %v121_v2 = vld [vmem:[#allocation6 + $0x10] sm:$0xff]  ;;  %v153_v3 = vsub.f32 %v57_v0, %v89_v1  ;;  %v119_v7 = vld [vmem:[#allocation6] sm:$0xff]  ;;  %v151_v8 = vsub.f32 %v55_v5, %v87_v6  ;;  %v90_v11 = vld [vmem:[#allocation4 + $0x18] sm:$0xff] }
  0x27   :  { %v185_v4 = vsub.f32 %v57_v0, %v121_v2  ;;  %v183_v9 = vsub.f32 %v55_v5, %v119_v7  ;;  %v122_v12 = vld [vmem:[#allocation6 + $0x18] sm:$0xff]  ;;  %v154_v15 = vsub.f32 %v58_v10, %v90_v11  ;;  %v56_v17 = vld [vmem:[#allocation2 + $0x8] sm:$0xff]  ;;  %v59_v31 = vld [vmem:[#allocation2 + $0x20] sm:$0xff] }
  0x28   :  { %v217_v13 = vmul.f32 %v153_v3, %v153_v3  ;;  %v186_v16 = vsub.f32 %v58_v10, %v122_v12  ;;  %v88_v18 = vld [vmem:[#allocation4 + $0x8] sm:$0xff]  ;;  %v215_v20 = vmul.f32 %v151_v8, %v151_v8  ;;  %v91_v32 = vld [vmem:[#allocation4 + $0x20] sm:$0xff]  ;;  %v62_v38 = vld [vmem:[#allocation2 + $0x38] sm:$0xff] }
  0x29   :  { %v249_v14 = vmul.f32 %v185_v4, %v185_v4  ;;  %v120_v19 = vld [vmem:[#allocation6 + $0x8] sm:$0xff]  ;;  %v247_v21 = vmul.f32 %v183_v9, %v183_v9  ;;  %v152_v22 = vsub.f32 %v56_v17, %v88_v18  ;;  %v218_v28 = vmul.f32 %v154_v15, %v154_v15  ;;  %v123_v33 = vld [vmem:[#allocation6 + $0x20] sm:$0xff]  ;;  %v94_v39 = vld [vmem:[#allocation4 + $0x38] sm:$0xff] }
  0x2a   :  { %v184_v23 = vsub.f32 %v56_v17, %v120_v19  ;;  %v60_v24 = vld [vmem:[#allocation2 + $0x28] sm:$0xff]  ;;  %v250_v29 = vmul.f32 %v186_v16, %v186_v16  ;;  %v126_v40 = vld [vmem:[#allocation6 + $0x38] sm:$0xff]  ;;  %v155_v43 = vsub.f32 %v59_v31, %v91_v32  ;;  %v187_v44 = vsub.f32 %v59_v31, %v123_v33  ;;  %v61_v45 = vld [vmem:[#allocation2 + $0x30] sm:$0xff] }
  0x2b   :  { %v92_v25 = vld [vmem:[#allocation4 + $0x28] sm:$0xff]  ;;  %v281_v27 = vsub.f32 %v217_v13, %v249_v14  ;;  %v279_v34 = vsub.f32 %v215_v20, %v247_v21  ;;  %v216_v35 = vmul.f32 %v152_v22, %v152_v22  ;;  %v93_v46 = vld [vmem:[#allocation4 + $0x30] sm:$0xff]  ;;  %v158_v50 = vsub.f32 %v62_v38, %v94_v39  ;;  %v63_v59 = vld [vmem:[#allocation2 + $0x40] sm:$0xff] }
  0x2c   :  { %v124_v26 = vld [vmem:[#allocation6 + $0x28] sm:$0xff]  ;;  %v156_v30 = vsub.f32 %v60_v24, %v92_v25  ;;  %v248_v36 = vmul.f32 %v184_v23, %v184_v23  ;;  %v282_v41 = vsub.f32 %v218_v28, %v250_v29  ;;  %v125_v47 = vld [vmem:[#allocation6 + $0x30] sm:$0xff]  ;;  %v190_v51 = vsub.f32 %v62_v38, %v126_v40  ;;  %v95_v60 = vld [vmem:[#allocation4 + $0x40] sm:$0xff] }
  0x2d   :  { %v188_v37 = vsub.f32 %v60_v24, %v124_v26  ;;  %315 = vadd.xlane.f32.xlu1 %v281_v27  ;;  %311 = vadd.xlane.f32.xlu0 %v279_v34  ;;  %v64_v52 = vld [vmem:[#allocation2 + $0x48] sm:$0xff]  ;;  %v219_v55 = vmul.f32 %v155_v43, %v155_v43  ;;  %v251_v56 = vmul.f32 %v187_v44, %v187_v44  ;;  %v127_v61 = vld [vmem:[#allocation6 + $0x40] sm:$0xff]  ;;  %v66_v4 = vld [vmem:[#allocation2 + $0x58] sm:$0xff] }
  0x2e   :  { %v220_v42 = vmul.f32 %v156_v30, %v156_v30  ;;  %v280_v48 = vsub.f32 %v216_v35, %v248_v36  ;;  %v96_v53 = vld [vmem:[#allocation4 + $0x48] sm:$0xff]  ;;  %v157_v57 = vsub.f32 %v61_v45, %v93_v46  ;;  %v189_v58 = vsub.f32 %v61_v45, %v125_v47  ;;  %v98_v5 = vld [vmem:[#allocation4 + $0x58] sm:$0xff]  ;;  %v65_v11 = vld [vmem:[#allocation2 + $0x50] sm:$0xff] }
  0x2f   :  { %v252_v49 = vmul.f32 %v188_v37, %v188_v37  ;;  %v128_v54 = vld [vmem:[#allocation6 + $0x48] sm:$0xff]  ;;  %v222_v62 = vmul.f32 %v158_v50, %v158_v50  ;;  %v254_v63 = vmul.f32 %v190_v51, %v190_v51  ;;  %v283_v1 = vsub.f32 %v219_v55, %v251_v56  ;;  %v130_v6 = vld [vmem:[#allocation6 + $0x58] sm:$0xff]  ;;  %v97_v12 = vld [vmem:[#allocation4 + $0x50] sm:$0xff] }
  0x30   :  { %v160_v2 = vsub.f32 %v64_v52, %v96_v53  ;;  %v192_v3 = vsub.f32 %v64_v52, %v128_v54  ;;  %v221_v7 = vmul.f32 %v157_v57, %v157_v57  ;;  %v253_v8 = vmul.f32 %v189_v58, %v189_v58  ;;  %v129_v13 = vld [vmem:[#allocation6 + $0x50] sm:$0xff]  ;;  %v68_v21 = vld [vmem:[#allocation2 + $0x68] sm:$0xff]  ;;  %v67_v27 = vld [vmem:[#allocation2 + $0x60] sm:$0xff] }
  0x31   :  { %317 = vadd.xlane.f32.xlu1 %v282_v41  ;;  %v284_v0 = vsub.f32 %v220_v42, %v252_v49  ;;  %313 = vadd.xlane.f32.xlu0 %v280_v48  ;;  %v159_v9 = vsub.f32 %v63_v59, %v95_v60  ;;  %v191_v10 = vsub.f32 %v63_v59, %v127_v61  ;;  %v100_v22 = vld [vmem:[#allocation4 + $0x68] sm:$0xff]  ;;  %v99_v28 = vld [vmem:[#allocation4 + $0x60] sm:$0xff]  ;;  %v70_v36 = vld [vmem:[#allocation2 + $0x78] sm:$0xff] }
  0x32   :  { %v286_v14 = vsub.f32 %v222_v62, %v254_v63  ;;  %v162_v15 = vsub.f32 %v66_v4, %v98_v5  ;;  %v194_v16 = vsub.f32 %v66_v4, %v130_v6  ;;  %v224_v17 = vmul.f32 %v160_v2, %v160_v2  ;;  %v132_v23 = vld [vmem:[#allocation6 + $0x68] sm:$0xff]  ;;  %v131_v29 = vld [vmem:[#allocation6 + $0x60] sm:$0xff]  ;;  %v102_v37 = vld [vmem:[#allocation4 + $0x78] sm:$0xff] }
  0x33   :  { %v256_v18 = vmul.f32 %v192_v3, %v192_v3  ;;  %v223_v19 = vmul.f32 %v159_v9, %v159_v9  ;;  %v255_v20 = vmul.f32 %v191_v10, %v191_v10  ;;  %v285_v24 = vsub.f32 %v221_v7, %v253_v8  ;;  %v134_v38 = vld [vmem:[#allocation6 + $0x78] sm:$0xff]  ;;  %v69_v43 = vld [vmem:[#allocation2 + $0x70] sm:$0xff]  ;;  %v72_v53 = vld [vmem:[#allocation2 + $0x88] sm:$0xff] }
  0x34   :  { %v161_v25 = vsub.f32 %v65_v11, %v97_v12  ;;  %v193_v26 = vsub.f32 %v65_v11, %v129_v13  ;;  %v226_v30 = vmul.f32 %v162_v15, %v162_v15  ;;  %v258_v31 = vmul.f32 %v194_v16, %v194_v16  ;;  %v101_v44 = vld [vmem:[#allocation4 + $0x70] sm:$0xff]  ;;  %v104_v54 = vld [vmem:[#allocation4 + $0x88] sm:$0xff]  ;;  %v71_v59 = vld [vmem:[#allocation2 + $0x80] sm:$0xff] }
  0x35   :  { %321 = vadd.xlane.f32.xlu1 %v284_v0  ;;  %319 = vadd.xlane.f32.xlu0 %v283_v1  ;;  %v164_v32 = vsub.f32 %v68_v21, %v100_v22  ;;  %v196_v33 = vsub.f32 %v68_v21, %v132_v23  ;;  %v288_v34 = vsub.f32 %v224_v17, %v256_v18  ;;  %v133_v45 = vld [vmem:[#allocation6 + $0x70] sm:$0xff]  ;;  %v136_v55 = vld [vmem:[#allocation6 + $0x88] sm:$0xff]  ;;  %v103_v60 = vld [vmem:[#allocation4 + $0x80] sm:$0xff] }
  0x36   :  { %v287_v35 = vsub.f32 %v223_v19, %v255_v20  ;;  %v225_v39 = vmul.f32 %v161_v25, %v161_v25  ;;  %v257_v40 = vmul.f32 %v193_v26, %v193_v26  ;;  %v163_v41 = vsub.f32 %v67_v27, %v99_v28  ;;  %v135_v61 = vld [vmem:[#allocation6 + $0x80] sm:$0xff]  ;;  %v74_v5 = vld [vmem:[#allocation2 + $0x98] sm:$0xff]  ;;  %v73_v11 = vld [vmem:[#allocation2 + $0x90] sm:$0xff] }
  0x37   :  { %v195_v42 = vsub.f32 %v67_v27, %v131_v29  ;;  %v290_v46 = vsub.f32 %v226_v30, %v258_v31  ;;  %v228_v47 = vmul.f32 %v164_v32, %v164_v32  ;;  %v260_v48 = vmul.f32 %v196_v33, %v196_v33  ;;  %v106_v6 = vld [vmem:[#allocation4 + $0x98] sm:$0xff]  ;;  %v105_v12 = vld [vmem:[#allocation4 + $0x90] sm:$0xff]  ;;  %v76_v20 = vld [vmem:[#allocation2 + $0xa8] sm:$0xff] }
  0x38   :  { %v166_v49 = vsub.f32 %v70_v36, %v102_v37  ;;  %v198_v50 = vsub.f32 %v70_v36, %v134_v38  ;;  %v165_v51 = vsub.f32 %v69_v43, %v101_v44  ;;  %v197_v52 = vsub.f32 %v69_v43, %v133_v45  ;;  %v138_v7 = vld [vmem:[#allocation6 + $0x98] sm:$0xff]  ;;  %v137_v13 = vld [vmem:[#allocation6 + $0x90] sm:$0xff]  ;;  %v108_v21 = vld [vmem:[#allocation4 + $0xa8] sm:$0xff] }
  0x39   :  { %325 = vadd.xlane.f32.xlu1 %v286_v14  ;;  %323 = vadd.xlane.f32.xlu0 %v285_v24  ;;  %v289_v56 = vsub.f32 %v225_v39, %v257_v40  ;;  %v227_v57 = vmul.f32 %v163_v41, %v163_v41  ;;  %v259_v58 = vmul.f32 %v195_v42, %v195_v42  ;;  %v140_v22 = vld [vmem:[#allocation6 + $0xa8] sm:$0xff]  ;;  %v75_v27 = vld [vmem:[#allocation2 + $0xa0] sm:$0xff]  ;;  %v78_v37 = vld [vmem:[#allocation2 + $0xb8] sm:$0xff] }
  0x3a   :  { %v292_v62 = vsub.f32 %v228_v47, %v260_v48  ;;  %v168_v63 = vsub.f32 %v72_v53, %v104_v54  ;;  %v200_v0 = vsub.f32 %v72_v53, %v136_v55  ;;  %v230_v1 = vmul.f32 %v166_v49, %v166_v49  ;;  %v107_v28 = vld [vmem:[#allocation4 + $0xa0] sm:$0xff]  ;;  %v110_v38 = vld [vmem:[#allocation4 + $0xb8] sm:$0xff]  ;;  %v77_v43 = vld [vmem:[#allocation2 + $0xb0] sm:$0xff] }
  0x3b   :  { %v262_v2 = vmul.f32 %v198_v50, %v198_v50  ;;  %v229_v3 = vmul.f32 %v165_v51, %v165_v51  ;;  %v261_v4 = vmul.f32 %v197_v52, %v197_v52  ;;  %v291_v8 = vsub.f32 %v227_v57, %v259_v58  ;;  %v139_v29 = vld [vmem:[#allocation6 + $0xa0] sm:$0xff]  ;;  %v142_v39 = vld [vmem:[#allocation6 + $0xb8] sm:$0xff]  ;;  %v109_v44 = vld [vmem:[#allocation4 + $0xb0] sm:$0xff] }
  0x3c   :  { %v167_v9 = vsub.f32 %v71_v59, %v103_v60  ;;  %v199_v10 = vsub.f32 %v71_v59, %v135_v61  ;;  %v232_v14 = vmul.f32 %v168_v63, %v168_v63  ;;  %v264_v15 = vmul.f32 %v200_v0, %v200_v0  ;;  %v141_v45 = vld [vmem:[#allocation6 + $0xb0] sm:$0xff]  ;;  %v112_v57 = vld [vmem:[#allocation4 + $0xc8] sm:$0xff]  ;;  %v79_v59 = vld [vmem:[#allocation2 + $0xc0] sm:$0xff] }
  0x3d   :  { %329 = vadd.xlane.f32.xlu1 %v288_v34  ;;  %327 = vadd.xlane.f32.xlu0 %v287_v35  ;;  %v170_v16 = vsub.f32 %v74_v5, %v106_v6  ;;  %v202_v17 = vsub.f32 %v74_v5, %v138_v7  ;;  %v294_v18 = vsub.f32 %v230_v1, %v262_v2  ;;  %v144_v58 = vld [vmem:[#allocation6 + $0xc8] sm:$0xff]  ;;  %v111_v60 = vld [vmem:[#allocation4 + $0xc0] sm:$0xff]  ;;  %v114_v5 = vld [vmem:[#allocation4 + $0xd8] sm:$0xff] }
  0x3e   :  { %v293_v19 = vsub.f32 %v229_v3, %v261_v4  ;;  %v231_v23 = vmul.f32 %v167_v9, %v167_v9  ;;  %v263_v24 = vmul.f32 %v199_v10, %v199_v10  ;;  %v169_v25 = vsub.f32 %v73_v11, %v105_v12  ;;  %v143_v61 = vld [vmem:[#allocation6 + $0xc0] sm:$0xff]  ;;  %v82_v4 = vld [vmem:[#allocation2 + $0xd8] sm:$0xff]  ;;  %v113_v12 = vld [vmem:[#allocation4 + $0xd0] sm:$0xff] }
  0x3f   :  { %v201_v26 = vsub.f32 %v73_v11, %v137_v13  ;;  %v296_v30 = vsub.f32 %v232_v14, %v264_v15  ;;  %v234_v31 = vmul.f32 %v170_v16, %v170_v16  ;;  %v266_v32 = vmul.f32 %v202_v17, %v202_v17  ;;  %v146_v6 = vld [vmem:[#allocation6 + $0xd8] sm:$0xff]  ;;  %v81_v11 = vld [vmem:[#allocation2 + $0xd0] sm:$0xff] }
  0x40   :  { %v172_v33 = vsub.f32 %v76_v20, %v108_v21  ;;  %v204_v34 = vsub.f32 %v76_v20, %v140_v22  ;;  %v171_v35 = vsub.f32 %v75_v27, %v107_v28  ;;  %v203_v36 = vsub.f32 %v75_v27, %v139_v29  ;;  %v145_v13 = vld [vmem:[#allocation6 + $0xd0] sm:$0xff]  ;;  %v84_v21 = vld [vmem:[#allocation2 + $0xe8] sm:$0xff]  ;;  %v83_v27 = vld [vmem:[#allocation2 + $0xe0] sm:$0xff] }
  0x41   :  { %333 = vadd.xlane.f32.xlu1 %v290_v46  ;;  %331 = vadd.xlane.f32.xlu0 %v289_v56  ;;  %v295_v40 = vsub.f32 %v231_v23, %v263_v24  ;;  %v233_v41 = vmul.f32 %v169_v25, %v169_v25  ;;  %v265_v42 = vmul.f32 %v201_v26, %v201_v26  ;;  %v80_v56 = vld [vmem:[#allocation2 + $0xc8] sm:$0xff]  ;;  %v115_v28 = vld [vmem:[#allocation4 + $0xe0] sm:$0xff] }
  0x42   :  { %v298_v46 = vsub.f32 %v234_v31, %v266_v32  ;;  %v174_v47 = vsub.f32 %v78_v37, %v110_v38  ;;  %v206_v48 = vsub.f32 %v78_v37, %v142_v39  ;;  %v236_v49 = vmul.f32 %v172_v33, %v172_v33  ;;  %v116_v22 = vld [vmem:[#allocation4 + $0xe8] sm:$0xff]  ;;  %v147_v29 = vld [vmem:[#allocation6 + $0xe0] sm:$0xff] }
  0x43   :  { %v268_v50 = vmul.f32 %v204_v34, %v204_v34  ;;  %v235_v51 = vmul.f32 %v171_v35, %v171_v35  ;;  %v267_v52 = vmul.f32 %v203_v36, %v203_v36  ;;  %v297_v53 = vsub.f32 %v233_v41, %v265_v42  ;;  %v148_v26 = vld [vmem:[#allocation6 + $0xe8] sm:$0xff]  ;;  %v118_v41 = vld [vmem:[#allocation4 + $0xf8] sm:$0xff] }
  0x44   :  { %v173_v54 = vsub.f32 %v77_v43, %v109_v44  ;;  %v205_v55 = vsub.f32 %v77_v43, %v141_v45  ;;  %v270_v63 = vmul.f32 %v206_v48, %v206_v48  ;;  %v176_v2 = vsub.f32 %v80_v56, %v112_v57  ;;  %v150_v42 = vld [vmem:[#allocation6 + $0xf8] sm:$0xff]  ;;  %v85_v43 = vld [vmem:[#allocation2 + $0xf0] sm:$0xff] }
  0x45   :  { %337 = vadd.xlane.f32.xlu1 %v292_v62  ;;  %335 = vadd.xlane.f32.xlu0 %v291_v8  ;;  %v238_v62 = vmul.f32 %v174_v47, %v174_v47  ;;  %v300_v0 = vsub.f32 %v236_v49, %v268_v50  ;;  %v299_v1 = vsub.f32 %v235_v51, %v267_v52  ;;  %v117_v44 = vld [vmem:[#allocation4 + $0xf0] sm:$0xff] }
  0x46   :  { %v208_v3 = vsub.f32 %v80_v56, %v144_v58  ;;  %v237_v7 = vmul.f32 %v173_v54, %v173_v54  ;;  %v269_v8 = vmul.f32 %v205_v55, %v205_v55  ;;  %v175_v9 = vsub.f32 %v79_v59, %v111_v60  ;;  %v149_v45 = vld [vmem:[#allocation6 + $0xf0] sm:$0xff] }
  0x47   :  { %v207_v10 = vsub.f32 %v79_v59, %v143_v61  ;;  %v302_v14 = vsub.f32 %v238_v62, %v270_v63  ;;  %v178_v15 = vsub.f32 %v82_v4, %v114_v5  ;;  %v210_v16 = vsub.f32 %v82_v4, %v146_v6 }
  0x48   :  { %v240_v17 = vmul.f32 %v176_v2, %v176_v2  ;;  %v209_v20 = vsub.f32 %v81_v11, %v145_v13  ;;  %v301_v23 = vsub.f32 %v237_v7, %v269_v8  ;;  %v239_v24 = vmul.f32 %v175_v9, %v175_v9 }
  0x49   :  { %341 = vadd.xlane.f32.xlu1 %v294_v18  ;;  %339 = vadd.xlane.f32.xlu0 %v293_v19  ;;  %v272_v18 = vmul.f32 %v208_v3, %v208_v3  ;;  %v177_v19 = vsub.f32 %v81_v11, %v113_v12  ;;  %v271_v25 = vmul.f32 %v207_v10, %v207_v10 }
  0x4a   :  { %v274_v31 = vmul.f32 %v210_v16, %v210_v16  ;;  %v180_v32 = vsub.f32 %v84_v21, %v116_v22  ;;  %v273_v35 = vmul.f32 %v209_v20, %v209_v20  ;;  %v212_v36 = vsub.f32 %v84_v21, %v148_v26 }
  0x4b   :  { %v304_v33 = vsub.f32 %v240_v17, %v272_v18  ;;  %v241_v34 = vmul.f32 %v177_v19, %v177_v19  ;;  %v303_v37 = vsub.f32 %v239_v24, %v271_v25  ;;  %v179_v38 = vsub.f32 %v83_v27, %v115_v28 }
  0x4c   :  { %v211_v39 = vsub.f32 %v83_v27, %v147_v29  ;;  %v244_v47 = vmul.f32 %v180_v32, %v180_v32  ;;  %v276_v49 = vmul.f32 %v212_v36, %v212_v36  ;;  %v181_v54 = vsub.f32 %v85_v43, %v117_v44 }
  0x4d   :  { %345 = vadd.xlane.f32.xlu1 %v296_v30  ;;  %343 = vadd.xlane.f32.xlu0 %v295_v40  ;;  %v242_v30 = vmul.f32 %v178_v15, %v178_v15  ;;  %v86_v40 = vld [vmem:[#allocation2 + $0xf8] sm:$0xff]  ;;  %v305_v48 = vsub.f32 %v241_v34, %v273_v35  ;;  %v243_v52 = vmul.f32 %v179_v38, %v179_v38 }
  0x4e   :  { %v182_v50 = vsub.f32 %v86_v40, %v118_v41  ;;  %v214_v51 = vsub.f32 %v86_v40, %v150_v42  ;;  %v213_v55 = vsub.f32 %v85_v43, %v149_v45  ;;  %v308_v56 = vsub.f32 %v244_v47, %v276_v49 }
  0x4f   :  { %v245_v60 = vmul.f32 %v181_v54, %v181_v54 }
  0x50   :  { %v246_v57 = vmul.f32 %v182_v50, %v182_v50  ;;  %v278_v58 = vmul.f32 %v214_v51, %v214_v51  ;;  %v277_v61 = vmul.f32 %v213_v55, %v213_v55 }
  0x51   :  { %349 = vadd.xlane.f32.xlu1 %v298_v46  ;;  %347 = vadd.xlane.f32.xlu0 %v297_v53  ;;  %v306_v46 = vsub.f32 %v242_v30, %v274_v31  ;;  %v275_v53 = vmul.f32 %v211_v39, %v211_v39 }
  0x52   :  { %v310_v62 = vsub.f32 %v246_v57, %v278_v58  ;;  %v309_v63 = vsub.f32 %v245_v60, %v277_v61 }
  0x53   :  { %v307_v59 = vsub.f32 %v243_v52, %v275_v53 }
  0x55   :  { %353 = vadd.xlane.f32.xlu1 %v300_v0  ;;  %351 = vadd.xlane.f32.xlu0 %v299_v1 }
  0x59   :  { %357 = vadd.xlane.f32.xlu1 %v302_v14  ;;  %355 = vadd.xlane.f32.xlu0 %v301_v23 }
  0x5d   :  { %361 = vadd.xlane.f32.xlu1 %v304_v33  ;;  %359 = vadd.xlane.f32.xlu0 %v303_v37 }
  0x61   :  { %365 = vadd.xlane.f32.xlu1 %v306_v46  ;;  %363 = vadd.xlane.f32.xlu0 %v305_v48 }
  0x65   :  { %369 = vadd.xlane.f32.xlu1 %v308_v56  ;;  %367 = vadd.xlane.f32.xlu0 %v307_v59 }
  0x69   :  { %373 = vadd.xlane.f32.xlu1 %v310_v62  ;;  %371 = vadd.xlane.f32.xlu0 %v309_v63 }
  0xb6   :  { %v316_v0 = vpop.xlane.xlu1 %315  ;;  %v312_v2 = vpop.xlane.xlu0 %311 }
  0xb7   :  { %v377_v1 = vadd.f32 1.0, %v316_v0  ;;  %v375_v3 = vadd.f32 1.0, %v312_v2 }
  0xb9   :  { %v409_v4 = vmax.f32 %v377_v1, 0.0  ;;  %v407_v5 = vmax.f32 %v375_v3, 0.0 }
  0xba   :  { %v318_v6 = vpop.xlane.xlu1 %317  ;;  %v314_v8 = vpop.xlane.xlu0 %313 }
  0xbb   :  { %442 = vst.msk [vmem:[%s712_s3 + $0x10] sm:$0xff] %vm439_vm0, %v409_v4  ;;  %v378_v7 = vadd.f32 1.0, %v318_v6  ;;  %440 = vst.msk [vmem:[%s712_s3] sm:$0xff] %vm439_vm0, %v407_v5  ;;  %v376_v9 = vadd.f32 1.0, %v314_v8 }
  0xbd   :  { %v410_v10 = vmax.f32 %v378_v7, 0.0  ;;  %v408_v11 = vmax.f32 %v376_v9, 0.0 }
  0xbe   :  { %v322_v12 = vpop.xlane.xlu1 %321  ;;  %v320_v14 = vpop.xlane.xlu0 %319 }
  0xbf   :  { %443 = vst.msk [vmem:[%s712_s3 + $0x18] sm:$0xff] %vm439_vm0, %v410_v10  ;;  %v380_v13 = vadd.f32 1.0, %v322_v12  ;;  %441 = vst.msk [vmem:[%s712_s3 + $0x8] sm:$0xff] %vm439_vm0, %v408_v11  ;;  %v379_v15 = vadd.f32 1.0, %v320_v14 }
  0xc1   :  { %v412_v16 = vmax.f32 %v380_v13, 0.0  ;;  %v411_v17 = vmax.f32 %v379_v15, 0.0 }
  0xc2   :  { %v326_v18 = vpop.xlane.xlu1 %325  ;;  %v324_v20 = vpop.xlane.xlu0 %323 }
  0xc3   :  { %445 = vst.msk [vmem:[%s712_s3 + $0x28] sm:$0xff] %vm439_vm0, %v412_v16  ;;  %v382_v19 = vadd.f32 1.0, %v326_v18  ;;  %444 = vst.msk [vmem:[%s712_s3 + $0x20] sm:$0xff] %vm439_vm0, %v411_v17  ;;  %v381_v21 = vadd.f32 1.0, %v324_v20 }
  0xc5   :  { %v414_v22 = vmax.f32 %v382_v19, 0.0  ;;  %v413_v23 = vmax.f32 %v381_v21, 0.0 }
  0xc6   :  { %v330_v24 = vpop.xlane.xlu1 %329  ;;  %v328_v26 = vpop.xlane.xlu0 %327 }
  0xc7   :  { %447 = vst.msk [vmem:[%s712_s3 + $0x38] sm:$0xff] %vm439_vm0, %v414_v22  ;;  %v384_v25 = vadd.f32 1.0, %v330_v24  ;;  %446 = vst.msk [vmem:[%s712_s3 + $0x30] sm:$0xff] %vm439_vm0, %v413_v23  ;;  %v383_v27 = vadd.f32 1.0, %v328_v26 }
  0xc9   :  { %v416_v28 = vmax.f32 %v384_v25, 0.0  ;;  %v415_v29 = vmax.f32 %v383_v27, 0.0 }
  0xca   :  { %v334_v30 = vpop.xlane.xlu1 %333  ;;  %v332_v32 = vpop.xlane.xlu0 %331 }
  0xcb   :  { %449 = vst.msk [vmem:[%s712_s3 + $0x48] sm:$0xff] %vm439_vm0, %v416_v28  ;;  %v386_v31 = vadd.f32 1.0, %v334_v30  ;;  %448 = vst.msk [vmem:[%s712_s3 + $0x40] sm:$0xff] %vm439_vm0, %v415_v29  ;;  %v385_v33 = vadd.f32 1.0, %v332_v32 }
  0xcd   :  { %v418_v34 = vmax.f32 %v386_v31, 0.0  ;;  %v417_v35 = vmax.f32 %v385_v33, 0.0 }
  0xce   :  { %v338_v36 = vpop.xlane.xlu1 %337  ;;  %v336_v38 = vpop.xlane.xlu0 %335 }
  0xcf   :  { %451 = vst.msk [vmem:[%s712_s3 + $0x58] sm:$0xff] %vm439_vm0, %v418_v34  ;;  %v388_v37 = vadd.f32 1.0, %v338_v36  ;;  %450 = vst.msk [vmem:[%s712_s3 + $0x50] sm:$0xff] %vm439_vm0, %v417_v35  ;;  %v387_v39 = vadd.f32 1.0, %v336_v38 }
  0xd1   :  { %v420_v40 = vmax.f32 %v388_v37, 0.0  ;;  %v419_v41 = vmax.f32 %v387_v39, 0.0 }
  0xd2   :  { %v342_v42 = vpop.xlane.xlu1 %341  ;;  %v340_v44 = vpop.xlane.xlu0 %339 }
  0xd3   :  { %453 = vst.msk [vmem:[%s712_s3 + $0x68] sm:$0xff] %vm439_vm0, %v420_v40  ;;  %v390_v43 = vadd.f32 1.0, %v342_v42  ;;  %452 = vst.msk [vmem:[%s712_s3 + $0x60] sm:$0xff] %vm439_vm0, %v419_v41  ;;  %v389_v45 = vadd.f32 1.0, %v340_v44 }
  0xd5   :  { %v422_v46 = vmax.f32 %v390_v43, 0.0  ;;  %v421_v47 = vmax.f32 %v389_v45, 0.0 }
  0xd6   :  { %v346_v48 = vpop.xlane.xlu1 %345  ;;  %v344_v50 = vpop.xlane.xlu0 %343 }
  0xd7   :  { %455 = vst.msk [vmem:[%s712_s3 + $0x78] sm:$0xff] %vm439_vm0, %v422_v46  ;;  %v392_v49 = vadd.f32 1.0, %v346_v48  ;;  %454 = vst.msk [vmem:[%s712_s3 + $0x70] sm:$0xff] %vm439_vm0, %v421_v47  ;;  %v391_v51 = vadd.f32 1.0, %v344_v50 }
  0xd9   :  { %v424_v52 = vmax.f32 %v392_v49, 0.0  ;;  %v423_v53 = vmax.f32 %v391_v51, 0.0 }
  0xda   :  { %v350_v54 = vpop.xlane.xlu1 %349  ;;  %v348_v56 = vpop.xlane.xlu0 %347 }
  0xdb   :  { %457 = vst.msk [vmem:[%s712_s3 + $0x88] sm:$0xff] %vm439_vm0, %v424_v52  ;;  %v394_v55 = vadd.f32 1.0, %v350_v54  ;;  %456 = vst.msk [vmem:[%s712_s3 + $0x80] sm:$0xff] %vm439_vm0, %v423_v53  ;;  %v393_v57 = vadd.f32 1.0, %v348_v56 }
  0xdd   :  { %v426_v58 = vmax.f32 %v394_v55, 0.0  ;;  %v425_v59 = vmax.f32 %v393_v57, 0.0 }
  0xde   :  { %v354_v60 = vpop.xlane.xlu1 %353  ;;  %v352_v62 = vpop.xlane.xlu0 %351 }
  0xdf   :  { %459 = vst.msk [vmem:[%s712_s3 + $0x98] sm:$0xff] %vm439_vm0, %v426_v58  ;;  %v396_v61 = vadd.f32 1.0, %v354_v60  ;;  %458 = vst.msk [vmem:[%s712_s3 + $0x90] sm:$0xff] %vm439_vm0, %v425_v59  ;;  %v395_v63 = vadd.f32 1.0, %v352_v62 }
  0xe1   :  { %v428_v0 = vmax.f32 %v396_v61, 0.0  ;;  %v427_v1 = vmax.f32 %v395_v63, 0.0 }
  0xe2   :  { %v358_v2 = vpop.xlane.xlu1 %357  ;;  %v356_v4 = vpop.xlane.xlu0 %355 }
  0xe3   :  { %461 = vst.msk [vmem:[%s712_s3 + $0xa8] sm:$0xff] %vm439_vm0, %v428_v0  ;;  %v398_v3 = vadd.f32 1.0, %v358_v2  ;;  %460 = vst.msk [vmem:[%s712_s3 + $0xa0] sm:$0xff] %vm439_vm0, %v427_v1  ;;  %v397_v5 = vadd.f32 1.0, %v356_v4 }
  0xe5   :  { %v430_v6 = vmax.f32 %v398_v3, 0.0  ;;  %v429_v7 = vmax.f32 %v397_v5, 0.0 }
  0xe6   :  { %v362_v8 = vpop.xlane.xlu1 %361  ;;  %v360_v10 = vpop.xlane.xlu0 %359 }
  0xe7   :  { %463 = vst.msk [vmem:[%s712_s3 + $0xb8] sm:$0xff] %vm439_vm0, %v430_v6  ;;  %v400_v9 = vadd.f32 1.0, %v362_v8  ;;  %462 = vst.msk [vmem:[%s712_s3 + $0xb0] sm:$0xff] %vm439_vm0, %v429_v7  ;;  %v399_v11 = vadd.f32 1.0, %v360_v10 }
  0xe9   :  { %v432_v12 = vmax.f32 %v400_v9, 0.0  ;;  %v431_v13 = vmax.f32 %v399_v11, 0.0 }
  0xea   :  { %v366_v14 = vpop.xlane.xlu1 %365  ;;  %v364_v16 = vpop.xlane.xlu0 %363 }
  0xeb   :  { %465 = vst.msk [vmem:[%s712_s3 + $0xc8] sm:$0xff] %vm439_vm0, %v432_v12  ;;  %v402_v15 = vadd.f32 1.0, %v366_v14  ;;  %464 = vst.msk [vmem:[%s712_s3 + $0xc0] sm:$0xff] %vm439_vm0, %v431_v13  ;;  %v401_v17 = vadd.f32 1.0, %v364_v16 }
  0xed   :  { %v434_v18 = vmax.f32 %v402_v15, 0.0  ;;  %v433_v19 = vmax.f32 %v401_v17, 0.0 }
  0xee   :  { %v370_v20 = vpop.xlane.xlu1 %369  ;;  %v368_v22 = vpop.xlane.xlu0 %367 }
  0xef   :  { %467 = vst.msk [vmem:[%s712_s3 + $0xd8] sm:$0xff] %vm439_vm0, %v434_v18  ;;  %v404_v21 = vadd.f32 1.0, %v370_v20  ;;  %466 = vst.msk [vmem:[%s712_s3 + $0xd0] sm:$0xff] %vm439_vm0, %v433_v19  ;;  %v403_v23 = vadd.f32 1.0, %v368_v22 }
  0xf1   :  { %v436_v24 = vmax.f32 %v404_v21, 0.0  ;;  %v435_v25 = vmax.f32 %v403_v23, 0.0 }
  0xf2   :  { %v374_v26 = vpop.xlane.xlu1 %373  ;;  %v372_v28 = vpop.xlane.xlu0 %371 }
  0xf3   :  { %469 = vst.msk [vmem:[%s712_s3 + $0xe8] sm:$0xff] %vm439_vm0, %v436_v24  ;;  %v406_v27 = vadd.f32 1.0, %v374_v26  ;;  %468 = vst.msk [vmem:[%s712_s3 + $0xe0] sm:$0xff] %vm439_vm0, %v435_v25  ;;  %v405_v29 = vadd.f32 1.0, %v372_v28 }
  0xf5   :  { %v438_v30 = vmax.f32 %v406_v27, 0.0  ;;  %v437_v31 = vmax.f32 %v405_v29, 0.0 }
  0xf7   :  { %471 = vst.msk [vmem:[%s712_s3 + $0xf8] sm:$0xff] %vm439_vm0, %v438_v30  ;;  %470 = vst.msk [vmem:[%s712_s3 + $0xf0] sm:$0xff] %vm439_vm0, %v437_v31 }
  0xf8   :  { %476 = vsyncpa [#allocation3], 1 }
  0xf9   :  { %477 = vsyncpa [#allocation5], 1 }

</bundles_post_ra>
